<compile_context>
chip_gen: v6e
topology: v6e:2x2x1
jax: 0.10.0
libtpu: 0.0.40
codegen_flags: <defaults>
</compile_context>

<pallas_src>
import jax
import jax.numpy as jnp
from jax.experimental import pallas as pl
from jax.experimental.pallas import tpu as pltpu

IN_F = 100    # 10*10 input features, kept unpadded
HID_P = 256   # 200 -> 256 (lane aligned)
OUT_P = 128   # 10  -> 128 (lane aligned, lane-dense output stores)


# -------------------- Pallas kernel: whole MLP forward on one batch tile ----
def mlp_kernel(x_ref,
               w1_ref, b1_ref,
               w2_ref, b2_ref,
               w3_ref, b3_ref,
               w4_ref, b4_ref,
               w5_ref, b5_ref,
               o_ref):
    # 5 dense layers; ReLU after the first four, linear output head.
    h = jnp.dot(x_ref[...], w1_ref[...], preferred_element_type=jnp.float32)
    h = jnp.maximum(h + b1_ref[...], 0.0)

    h = jnp.dot(h, w2_ref[...], preferred_element_type=jnp.float32)
    h = jnp.maximum(h + b2_ref[...], 0.0)

    h = jnp.dot(h, w3_ref[...], preferred_element_type=jnp.float32)
    h = jnp.maximum(h + b3_ref[...], 0.0)

    h = jnp.dot(h, w4_ref[...], preferred_element_type=jnp.float32)
    h = jnp.maximum(h + b4_ref[...], 0.0)

    h = jnp.dot(h, w5_ref[...], preferred_element_type=jnp.float32)
    o_ref[...] = h + b5_ref[...]


# -------------------- one-time parameter prep (padding hoisted out) ---------
def _pad2(a, rows, cols):
    r, c = a.shape
    return jnp.pad(a, ((0, rows - r), (0, cols - c)))


def prep_params(params):
    """Zero-pad weights/biases to lane-aligned shapes ONCE, outside the
    per-call forward path."""
    (w1, b1), (w2, b2), (w3, b3), (w4, b4), (w5, b5) = params
    return (
        (_pad2(w1, IN_F, HID_P),  _pad2(b1[None, :], 1, HID_P)),
        (_pad2(w2, HID_P, HID_P), _pad2(b2[None, :], 1, HID_P)),
        (_pad2(w3, HID_P, HID_P), _pad2(b3[None, :], 1, HID_P)),
        (_pad2(w4, HID_P, HID_P), _pad2(b4[None, :], 1, HID_P)),
        (_pad2(w5, HID_P, OUT_P), _pad2(b5[None, :], 1, OUT_P)),
    )


def _round_up(n, m):
    return ((n + m - 1) // m) * m


# -------------------- forward wrapper ---------------------------------------
def mlp_forward(x, padded_params, max_batch_tile=512):
    """x: (B, 10, 10) or (B, 100) float32. Returns (B, 10) float32."""
    x = x.reshape(-1, IN_F)                     # x.view(-1, 10*10)
    B = x.shape[0]

    # Batch tile: small batches -> a single grid step; large batches -> 512-row
    # tiles (double-buffered x/out + intermediates stay well under v7x's 32 MiB
    # default scoped VMEM and v5e's 16 MiB; weights ~1 MiB stay resident).
    TB = min(max_batch_tile, _round_up(B, 8))
    Bp = _round_up(B, TB)
    if Bp != B:
        x = jnp.pad(x, ((0, Bp - B), (0, 0)))   # zero rows: harmless, sliced off

    (w1, b1), (w2, b2), (w3, b3), (w4, b4), (w5, b5) = padded_params

    const = lambda i: (0, 0)                    # weights/biases: VMEM-resident
    w_specs = []
    for w, b in padded_params:
        w_specs.append(pl.BlockSpec(w.shape, const))
        w_specs.append(pl.BlockSpec(b.shape, const))

    flops = 2 * Bp * (IN_F * HID_P + 3 * HID_P * HID_P + HID_P * OUT_P)
    bytes_accessed = (
        Bp * IN_F * 4 + Bp * OUT_P * 4
        + sum(w.size * 4 + b.size * 4 for w, b in padded_params))

    out_p = pl.pallas_call(
        mlp_kernel,
        out_shape=jax.ShapeDtypeStruct((Bp, OUT_P), jnp.float32),
        grid=(Bp // TB,),
        in_specs=[pl.BlockSpec((TB, IN_F), lambda i: (i, 0))] + w_specs,
        out_specs=pl.BlockSpec((TB, OUT_P), lambda i: (i, 0)),
        compiler_params=pltpu.CompilerParams(
            dimension_semantics=("parallel",)),   # shard batch steps over TCs
        cost_estimate=pl.CostEstimate(
            flops=flops, transcendentals=0, bytes_accessed=bytes_accessed),
    )(x, w1, b1, w2, b2, w3, b3, w4, b4, w5, b5)

    return out_p[:B, :10]


# -------------------- deterministic parameter init --------------------------
def init_params(key):
    """Mimics nn.Linear default init: U(-1/sqrt(fan_in), 1/sqrt(fan_in))."""
    dims = [(100, 200), (200, 200), (200, 200), (200, 200), (200, 10)]
    params = []
    for (fan_in, fan_out) in dims:
        key, kw, kb = jax.random.split(key, 3)
        bound = 1.0 / jnp.sqrt(jnp.float32(fan_in))
        w = jax.random.uniform(kw, (fan_in, fan_out), jnp.float32, -bound, bound)
        b = jax.random.uniform(kb, (fan_out,), jnp.float32, -bound, bound)
        params.append((w, b))
    return params


# -------------------- pure-JAX reference for a sanity check ------------------
def mlp_reference(x, params):
    x = x.reshape(-1, IN_F)
    (w1, b1), (w2, b2), (w3, b3), (w4, b4), (w5, b5) = params
    h = jnp.maximum(x @ w1 + b1, 0.0)
    h = jnp.maximum(h @ w2 + b2, 0.0)
    h = jnp.maximum(h @ w3 + b3, 0.0)
    h = jnp.maximum(h @ w4 + b4, 0.0)
    return h @ w5 + b5


if __name__ == "__main__":
    key = jax.random.PRNGKey(0)
    key, kx = jax.random.split(key)
    # Small MNIST-like input: batch=8, 10x10 "images" (module expects 10*10 features).
    x = jax.random.normal(kx, (8, 10, 10), dtype=jnp.float32)
    params = init_params(key)

    # One-time padding of parameters (hoisted out of the per-call path).
    padded_params = jax.tree_util.tree_map(lambda a: a, prep_params(params))

    forward = jax.jit(mlp_forward)
    out = forward(x, padded_params)
    out = jax.block_until_ready(out)

    ref = mlp_reference(x, params)
    assert out.shape == (8, 10)
    assert jnp.allclose(out, ref, atol=1e-4, rtol=1e-4)

    print("KERNEL_OK")
</pallas_src>

<mosaic_0001>
module attributes {stable_mosaic.version = 11 : i64} {
  func.func @mlp_kernel(%arg0: i32, %arg1: memref<8x100xf32, #tpu.memory_space<vmem>>, %arg2: memref<100x256xf32, #tpu.memory_space<vmem>>, %arg3: memref<1x256xf32, #tpu.memory_space<vmem>>, %arg4: memref<256x256xf32, #tpu.memory_space<vmem>>, %arg5: memref<1x256xf32, #tpu.memory_space<vmem>>, %arg6: memref<256x256xf32, #tpu.memory_space<vmem>>, %arg7: memref<1x256xf32, #tpu.memory_space<vmem>>, %arg8: memref<256x256xf32, #tpu.memory_space<vmem>>, %arg9: memref<1x256xf32, #tpu.memory_space<vmem>>, %arg10: memref<256x128xf32, #tpu.memory_space<vmem>>, %arg11: memref<1x128xf32, #tpu.memory_space<vmem>>, %arg12: memref<8x128xf32, #tpu.memory_space<vmem>>) attributes {dimension_semantics = [#tpu.dimension_semantics<parallel>], iteration_bounds = array<i64: 1>, scalar_prefetch = 0 : i64, scratch_operands = 0 : i64, tpu.core_type = #tpu.core_type<tc>, window_params = [{transform_indices = @transform_0, window_bounds = array<i64: 8, 100>}, {pipeline_mode = #tpu.pipeline_mode<synchronous>, transform_indices = @transform_1, window_bounds = array<i64: 100, 256>}, {pipeline_mode = #tpu.pipeline_mode<synchronous>, transform_indices = @transform_2, window_bounds = array<i64: 1, 256>}, {pipeline_mode = #tpu.pipeline_mode<synchronous>, transform_indices = @transform_3, window_bounds = array<i64: 256, 256>}, {pipeline_mode = #tpu.pipeline_mode<synchronous>, transform_indices = @transform_4, window_bounds = array<i64: 1, 256>}, {pipeline_mode = #tpu.pipeline_mode<synchronous>, transform_indices = @transform_5, window_bounds = array<i64: 256, 256>}, {pipeline_mode = #tpu.pipeline_mode<synchronous>, transform_indices = @transform_6, window_bounds = array<i64: 1, 256>}, {pipeline_mode = #tpu.pipeline_mode<synchronous>, transform_indices = @transform_7, window_bounds = array<i64: 256, 256>}, {pipeline_mode = #tpu.pipeline_mode<synchronous>, transform_indices = @transform_8, window_bounds = array<i64: 1, 256>}, {pipeline_mode = #tpu.pipeline_mode<synchronous>, transform_indices = @transform_9, window_bounds = array<i64: 256, 128>}, {pipeline_mode = #tpu.pipeline_mode<synchronous>, transform_indices = @transform_10, window_bounds = array<i64: 1, 128>}, {transform_indices = @transform_11, window_bounds = array<i64: 8, 128>}]} {
    %c0 = arith.constant 0 : index
    %c0_0 = arith.constant 0 : index
    %0 = vector.load %arg1[%c0, %c0_0] : memref<8x100xf32, #tpu.memory_space<vmem>>, vector<8x100xf32>
    %c0_1 = arith.constant 0 : index
    %c0_2 = arith.constant 0 : index
    %1 = vector.load %arg2[%c0_1, %c0_2] : memref<100x256xf32, #tpu.memory_space<vmem>>, vector<100x256xf32>
    %cst = arith.constant dense<0.000000e+00> : vector<8x256xf32>
    %2 = tpu.matmul %0, %1, %cst {dimension_numbers = #tpu.dot_dimension_numbers<[1], [0], [0], [1], [0, 0, 1, 1], [], []>} : vector<8x100xf32>, vector<100x256xf32>, vector<8x256xf32> -> vector<8x256xf32>
    %c0_3 = arith.constant 0 : index
    %c0_4 = arith.constant 0 : index
    %3 = vector.load %arg3[%c0_3, %c0_4] : memref<1x256xf32, #tpu.memory_space<vmem>>, vector<1x256xf32>
    %4 = vector.broadcast %3 : vector<1x256xf32> to vector<8x256xf32>
    %5 = arith.addf %2, %4 : vector<8x256xf32>
    %cst_5 = arith.constant 0.000000e+00 : f32
    %6 = vector.broadcast %cst_5 : f32 to vector<8x256xf32>
    %7 = arith.maximumf %5, %6 : vector<8x256xf32>
    %c0_6 = arith.constant 0 : index
    %c0_7 = arith.constant 0 : index
    %8 = vector.load %arg4[%c0_6, %c0_7] : memref<256x256xf32, #tpu.memory_space<vmem>>, vector<256x256xf32>
    %cst_8 = arith.constant dense<0.000000e+00> : vector<8x256xf32>
    %9 = tpu.matmul %7, %8, %cst_8 {dimension_numbers = #tpu.dot_dimension_numbers<[1], [0], [0], [1], [0, 0, 1, 1], [], []>} : vector<8x256xf32>, vector<256x256xf32>, vector<8x256xf32> -> vector<8x256xf32>
    %c0_9 = arith.constant 0 : index
    %c0_10 = arith.constant 0 : index
    %10 = vector.load %arg5[%c0_9, %c0_10] : memref<1x256xf32, #tpu.memory_space<vmem>>, vector<1x256xf32>
    %11 = vector.broadcast %10 : vector<1x256xf32> to vector<8x256xf32>
    %12 = arith.addf %9, %11 : vector<8x256xf32>
    %cst_11 = arith.constant 0.000000e+00 : f32
    %13 = vector.broadcast %cst_11 : f32 to vector<8x256xf32>
    %14 = arith.maximumf %12, %13 : vector<8x256xf32>
    %c0_12 = arith.constant 0 : index
    %c0_13 = arith.constant 0 : index
    %15 = vector.load %arg6[%c0_12, %c0_13] : memref<256x256xf32, #tpu.memory_space<vmem>>, vector<256x256xf32>
    %cst_14 = arith.constant dense<0.000000e+00> : vector<8x256xf32>
    %16 = tpu.matmul %14, %15, %cst_14 {dimension_numbers = #tpu.dot_dimension_numbers<[1], [0], [0], [1], [0, 0, 1, 1], [], []>} : vector<8x256xf32>, vector<256x256xf32>, vector<8x256xf32> -> vector<8x256xf32>
    %c0_15 = arith.constant 0 : index
    %c0_16 = arith.constant 0 : index
    %17 = vector.load %arg7[%c0_15, %c0_16] : memref<1x256xf32, #tpu.memory_space<vmem>>, vector<1x256xf32>
    %18 = vector.broadcast %17 : vector<1x256xf32> to vector<8x256xf32>
    %19 = arith.addf %16, %18 : vector<8x256xf32>
    %cst_17 = arith.constant 0.000000e+00 : f32
    %20 = vector.broadcast %cst_17 : f32 to vector<8x256xf32>
    %21 = arith.maximumf %19, %20 : vector<8x256xf32>
    %c0_18 = arith.constant 0 : index
    %c0_19 = arith.constant 0 : index
    %22 = vector.load %arg8[%c0_18, %c0_19] : memref<256x256xf32, #tpu.memory_space<vmem>>, vector<256x256xf32>
    %cst_20 = arith.constant dense<0.000000e+00> : vector<8x256xf32>
    %23 = tpu.matmul %21, %22, %cst_20 {dimension_numbers = #tpu.dot_dimension_numbers<[1], [0], [0], [1], [0, 0, 1, 1], [], []>} : vector<8x256xf32>, vector<256x256xf32>, vector<8x256xf32> -> vector<8x256xf32>
    %c0_21 = arith.constant 0 : index
    %c0_22 = arith.constant 0 : index
    %24 = vector.load %arg9[%c0_21, %c0_22] : memref<1x256xf32, #tpu.memory_space<vmem>>, vector<1x256xf32>
    %25 = vector.broadcast %24 : vector<1x256xf32> to vector<8x256xf32>
    %26 = arith.addf %23, %25 : vector<8x256xf32>
    %cst_23 = arith.constant 0.000000e+00 : f32
    %27 = vector.broadcast %cst_23 : f32 to vector<8x256xf32>
    %28 = arith.maximumf %26, %27 : vector<8x256xf32>
    %c0_24 = arith.constant 0 : index
    %c0_25 = arith.constant 0 : index
    %29 = vector.load %arg10[%c0_24, %c0_25] : memref<256x128xf32, #tpu.memory_space<vmem>>, vector<256x128xf32>
    %cst_26 = arith.constant dense<0.000000e+00> : vector<8x128xf32>
    %30 = tpu.matmul %28, %29, %cst_26 {dimension_numbers = #tpu.dot_dimension_numbers<[1], [0], [0], [1], [0, 0, 1, 1], [], []>} : vector<8x256xf32>, vector<256x128xf32>, vector<8x128xf32> -> vector<8x128xf32>
    %c0_27 = arith.constant 0 : index
    %c0_28 = arith.constant 0 : index
    %31 = vector.load %arg11[%c0_27, %c0_28] : memref<1x128xf32, #tpu.memory_space<vmem>>, vector<1x128xf32>
    %32 = vector.broadcast %31 : vector<1x128xf32> to vector<8x128xf32>
    %33 = arith.addf %30, %32 : vector<8x128xf32>
    %c0_29 = arith.constant 0 : index
    %c0_30 = arith.constant 0 : index
    %34 = vector.load %arg12[%c0_29, %c0_30] : memref<8x128xf32, #tpu.memory_space<vmem>>, vector<8x128xf32>
    tpu.vector_store %arg12[%c0_29, %c0_30], %33 {strides = array<i32>} : memref<8x128xf32, #tpu.memory_space<vmem>>, vector<8x128xf32>,
    return
  }
  func.func @transform_0(%arg0: i32) -> (i32, i32) {
    %c0_i32 = arith.constant 0 : i32
    %c0_i32_0 = arith.constant 0 : i32
    return %arg0, %c0_i32 : i32, i32
  }
  func.func @transform_1(%arg0: i32) -> (i32, i32) {
    %c0_i32 = arith.constant 0 : i32
    %c0_i32_0 = arith.constant 0 : i32
    %c0_i32_1 = arith.constant 0 : i32
    return %c0_i32, %c0_i32_0 : i32, i32
  }
  func.func @transform_2(%arg0: i32) -> (i32, i32) {
    %c0_i32 = arith.constant 0 : i32
    %c0_i32_0 = arith.constant 0 : i32
    %c0_i32_1 = arith.constant 0 : i32
    return %c0_i32, %c0_i32_0 : i32, i32
  }
  func.func @transform_3(%arg0: i32) -> (i32, i32) {
    %c0_i32 = arith.constant 0 : i32
    %c0_i32_0 = arith.constant 0 : i32
    %c0_i32_1 = arith.constant 0 : i32
    return %c0_i32, %c0_i32_0 : i32, i32
  }
  func.func @transform_4(%arg0: i32) -> (i32, i32) {
    %c0_i32 = arith.constant 0 : i32
    %c0_i32_0 = arith.constant 0 : i32
    %c0_i32_1 = arith.constant 0 : i32
    return %c0_i32, %c0_i32_0 : i32, i32
  }
  func.func @transform_5(%arg0: i32) -> (i32, i32) {
    %c0_i32 = arith.constant 0 : i32
    %c0_i32_0 = arith.constant 0 : i32
    %c0_i32_1 = arith.constant 0 : i32
    return %c0_i32, %c0_i32_0 : i32, i32
  }
  func.func @transform_6(%arg0: i32) -> (i32, i32) {
    %c0_i32 = arith.constant 0 : i32
    %c0_i32_0 = arith.constant 0 : i32
    %c0_i32_1 = arith.constant 0 : i32
    return %c0_i32, %c0_i32_0 : i32, i32
  }
  func.func @transform_7(%arg0: i32) -> (i32, i32) {
    %c0_i32 = arith.constant 0 : i32
    %c0_i32_0 = arith.constant 0 : i32
    %c0_i32_1 = arith.constant 0 : i32
    return %c0_i32, %c0_i32_0 : i32, i32
  }
  func.func @transform_8(%arg0: i32) -> (i32, i32) {
    %c0_i32 = arith.constant 0 : i32
    %c0_i32_0 = arith.constant 0 : i32
    %c0_i32_1 = arith.constant 0 : i32
    return %c0_i32, %c0_i32_0 : i32, i32
  }
  func.func @transform_9(%arg0: i32) -> (i32, i32) {
    %c0_i32 = arith.constant 0 : i32
    %c0_i32_0 = arith.constant 0 : i32
    %c0_i32_1 = arith.constant 0 : i32
    return %c0_i32, %c0_i32_0 : i32, i32
  }
  func.func @transform_10(%arg0: i32) -> (i32, i32) {
    %c0_i32 = arith.constant 0 : i32
    %c0_i32_0 = arith.constant 0 : i32
    %c0_i32_1 = arith.constant 0 : i32
    return %c0_i32, %c0_i32_0 : i32, i32
  }
  func.func @transform_11(%arg0: i32) -> (i32, i32) {
    %c0_i32 = arith.constant 0 : i32
    %c0_i32_0 = arith.constant 0 : i32
    return %arg0, %c0_i32 : i32, i32
  }
}

</mosaic_0001>

<bundles_post_ra>
// kernel: mlp_forward.1
= control target key start
LH: loop header
LB: loop body
LE: loop exit
PB: predicated region body
PF: predicated region fallthrough
CT: control target
= control target key end

     0   :  { %16 = vsyncpa [#allocation3], 0  ;;  %s1167_s0 = inlined_call_operand.vmem [shape: f32[8,100], index: 0, kind: input, shape index: {}]   ;;  %s1168_s1 = inlined_call_operand.hbm [shape: f32[100,256], index: 1, kind: input, shape index: {}]   ;;  %s1169_s2 = inlined_call_operand.vmem [shape: f32[1,256], index: 2, kind: input, shape index: {}]   ;;  %s1170_s3 = inlined_call_operand.hbm [shape: f32[256,256], index: 3, kind: input, shape index: {}]   ;;  %s1171_s4 = inlined_call_operand.vmem [shape: f32[1,256], index: 4, kind: input, shape index: {}]   ;;  %s1172_s5 = inlined_call_operand.hbm [shape: f32[256,256], index: 5, kind: input, shape index: {}]   ;;  %s1173_s6 = inlined_call_operand.vmem [shape: f32[1,256], index: 6, kind: input, shape index: {}]   ;;  %s1174_s7 = inlined_call_operand.hbm [shape: f32[256,256], index: 7, kind: input, shape index: {}]   ;;  %s1175_s8 = inlined_call_operand.vmem [shape: f32[1,256], index: 8, kind: input, shape index: {}]   ;;  %s1176_s9 = inlined_call_operand.vmem [shape: f32[256,128], index: 9, kind: input, shape index: {}]   ;;  %s1177_s10 = inlined_call_operand.vmem [shape: f32[1,128], index: 10, kind: input, shape index: {}]   ;;  %s1178_s11 = inlined_call_operand.hbm [shape: f32[8,128], index: 11, kind: output, shape index: {}]  }
   0x1   :  { %17 = vsyncpa [#allocation6], 0 }
   0x2   :  { %18 = vsyncpa [#allocation9], 0 }
   0x3   :  { %19 = vsyncpa [#allocation4], 0  ;;  %s946_s17 = smov [#allocation5]   ;;  %s947_s19 = smov [#allocation2]  }
   0x4   :  { %s41_s18 = sshll.u32 %s946_s17, 4  ;;  %s27_s20 = sshll.u32 %s947_s19, 4  ;;  %s42_s18 = int_to_ptr.vmem [resolvable:$true] %s41_s18  ;;  %s28_s20 = int_to_ptr.vmem [resolvable:$true] %s27_s20 }
   0x5   :  { %s846_s21 = scalar_lea.vmem %s42_s18, 8192  ;;  %p851_p1 = scmp.lt.s32.totalorder %s42_s18, %s42_s18 }
   0x6   :  { %p847_p0 = scmp.ne.s32.totalorder %s42_s18, %s846_s21  ;;  %p852_p2 = scmp.lt.s32.totalorder %s846_s21, %s846_s21 }
   0x8   :  { %p853_p3 = por %p852_p2, %p851_p1 }
   0xa   :  { %p854_p4 = pnand %p853_p3, %p847_p0 }
   0xc   :  { %857 = shalt.err (!%p854_p4)
}
   0xd   :  { %s948_s22 = smov 256   ;;  %s949_s23 = smov 16  }
   0xe   :  { %47 = dma.hbm_to_vmem [thread:$0]  %s1170_s3, 8192, %s42_s18, [#allocation6], %s948_s22, %s948_s22, %s949_s23  }
   0xf   :  { %s866_s26 = scalar_lea.vmem %s28_s20, 3328  ;;  %p871_p6 = scmp.lt.s32.totalorder %s28_s20, %s28_s20 }
  0x10   :  { %p867_p5 = scmp.ne.s32.totalorder %s28_s20, %s866_s26  ;;  %p872_p7 = scmp.lt.s32.totalorder %s866_s26, %s866_s26 }
  0x12   :  { %p873_p8 = por %p872_p7, %p871_p6 }
  0x14   :  { %p874_p9 = pnand %p873_p8, %p867_p5 }
  0x16   :  { %877 = shalt.err (!%p874_p9)
}
  0x17   :  { %33 = dma.hbm_to_vmem [thread:$0]  %s1168_s1, 3328, %s28_s20, [#allocation3], %s948_s22, %s948_s22, %s949_s23  }
  0x18   :  { %s950_s29 = smov [#allocation7]   ;;  %s951_s12 = smov [#allocation8]  }
  0x19   :  { %s55_s30 = sshll.u32 %s950_s29, 4  ;;  %s69_s13 = sshll.u32 %s951_s12, 4  ;;  %s56_s30 = int_to_ptr.vmem [resolvable:$true] %s55_s30  ;;  %s70_s13 = int_to_ptr.vmem [resolvable:$true] %s69_s13 }
  0x1a   :  { %s886_s3 = scalar_lea.vmem %s56_s30, 8192  ;;  %p891_p11 = scmp.lt.s32.totalorder %s56_s30, %s56_s30 }
  0x1b   :  { %p887_p10 = scmp.ne.s32.totalorder %s56_s30, %s886_s3  ;;  %p892_p12 = scmp.lt.s32.totalorder %s886_s3, %s886_s3 }
  0x1d   :  { %p893_p13 = por %p892_p12, %p891_p11 }
  0x1f   :  { %p894_p0 = pnand %p893_p13, %p887_p10 }
  0x21   :  { %897 = shalt.err (!%p894_p0)
}
  0x22   :  { %61 = dma.hbm_to_vmem [thread:$0]  %s1172_s5, 8192, %s56_s30, [#allocation6], %s948_s22, %s948_s22, %s949_s23  }
  0x23   :  { %s906_s1 = scalar_lea.vmem %s70_s13, 8192  ;;  %p911_p2 = scmp.lt.s32.totalorder %s70_s13, %s70_s13 }
  0x24   :  { %p907_p1 = scmp.ne.s32.totalorder %s70_s13, %s906_s1  ;;  %p912_p3 = scmp.lt.s32.totalorder %s906_s1, %s906_s1 }
  0x26   :  { %p913_p4 = por %p912_p3, %p911_p2 }
  0x28   :  { %p914_p5 = pnand %p913_p4, %p907_p1 }
  0x2a   :  { %917 = shalt.err (!%p914_p5)
}
  0x2b   :  { %75 = dma.hbm_to_vmem [thread:$0]  %s1174_s7, 8192, %s70_s13, [#allocation9], %s948_s22, %s948_s22, %s949_s23  }
  0x2c   :  { %938 = dma.done.wait [#allocation3], 3328  }
  0x2d   :  { %939 = vsyncadd [#allocation3], 4294963968 }
  0x2e   :  { %940 = dma.done.wait [#allocation6], 16384  }
  0x2f   :  { %941 = vsyncadd [#allocation6], 4294950912 }
  0x30   :  { %942 = dma.done.wait [#allocation9], 8192  }
  0x31   :  { %943 = vsyncadd [#allocation9], 4294959104  ;;  %v952_v0 = vmov 0.0   ;;  %vm137_vm0 = vcmask 1043456   ;;  %v120_v1 = vld [vmem:[#allocation2 + $0xc8] sm:$0xf] }
  0x32   :  { %208 = vmatprep.mubr.f32.mxu0 %v952_v0  ;;  %v119_v2 = vld [vmem:[#allocation2 + $0xc0] sm:$0xf]  ;;  %v118_v3 = vld [vmem:[#allocation2 + $0xb8] sm:$0xff]  ;;  %791 = vmatprep.subr.msk.mxu0 %vm137_vm0, %v120_v1  ;;  %v117_v4 = vld [vmem:[#allocation2 + $0xb0] sm:$0xff]  ;;  %vm133_vm1 = vcmask 818176   ;;  %s953_s15 = smov [#allocation10]  }
  0x33   :  { %792 = vmatpush1.msk.msra.mxu0 %vm137_vm0, %v119_v2  ;;  %v116_v5 = vld [vmem:[#allocation2 + $0xa8] sm:$0xff]  ;;  %v115_v6 = vld [vmem:[#allocation2 + $0xa0] sm:$0xff]  ;;  %v114_v7 = vld [vmem:[#allocation2 + $0x98] sm:$0xff] }
  0x34   :  { %152 = vmatprep.subr.mxu0 %v118_v3  ;;  %v113_v8 = vld [vmem:[#allocation2 + $0x90] sm:$0xff]  ;;  %v112_v9 = vld [vmem:[#allocation2 + $0x88] sm:$0xff]  ;;  %v111_v10 = vld [vmem:[#allocation2 + $0x80] sm:$0xff] }
  0x35   :  { %153 = vmatpush1.msra.mxu0 %v117_v4  ;;  %v110_v11 = vld [vmem:[#allocation2 + $0x78] sm:$0xff]  ;;  %v109_v12 = vld [vmem:[#allocation2 + $0x70] sm:$0xff]  ;;  %v248_v13 = vld [vmem:[#allocation5 + $0xf8] sm:$0xff] }
  0x36   :  { %154 = vmatprep.subr.mxu0 %v116_v5  ;;  %v247_v14 = vld [vmem:[#allocation5 + $0xf0] sm:$0xff]  ;;  %v246_v15 = vld [vmem:[#allocation5 + $0xe8] sm:$0xff]  ;;  %v108_v16 = vld [vmem:[#allocation2 + $0x68] sm:$0xff]  ;;  %293 = vmatprep.subr.mxu1 %v248_v13 }
  0x37   :  { %155 = vmatpush1.msra.mxu0 %v115_v6  ;;  %v245_v17 = vld [vmem:[#allocation5 + $0xe0] sm:$0xff]  ;;  %v107_v18 = vld [vmem:[#allocation2 + $0x60] sm:$0xff]  ;;  %294 = vmatpush1.msra.mxu1 %v247_v14  ;;  %v244_v19 = vld [vmem:[#allocation5 + $0xd8] sm:$0xff] }
  0x38   :  { %156 = vmatprep.subr.mxu0 %v114_v7  ;;  %v106_v20 = vld [vmem:[#allocation2 + $0x58] sm:$0xff]  ;;  %295 = vmatprep.subr.mxu1 %v246_v15  ;;  %v243_v21 = vld [vmem:[#allocation5 + $0xd0] sm:$0xff]  ;;  %v105_v22 = vld [vmem:[#allocation2 + $0x50] sm:$0xff] }
  0x39   :  { %157 = vmatpush1.msra.mxu0 %v113_v8  ;;  %296 = vmatpush1.msra.mxu1 %v245_v17  ;;  %v242_v23 = vld [vmem:[#allocation5 + $0xc8] sm:$0xff]  ;;  %v104_v24 = vld [vmem:[#allocation2 + $0x48] sm:$0xff]  ;;  %v241_v25 = vld [vmem:[#allocation5 + $0xc0] sm:$0xff] }
  0x3a   :  { %158 = vmatprep.subr.mxu0 %v112_v9  ;;  %297 = vmatprep.subr.mxu1 %v244_v19  ;;  %v103_v26 = vld [vmem:[#allocation2 + $0x40] sm:$0xff]  ;;  %v240_v27 = vld [vmem:[#allocation5 + $0xb8] sm:$0xff]  ;;  %v102_v28 = vld [vmem:[#allocation2 + $0x38] sm:$0xff] }
  0x3b   :  { %159 = vmatpush1.msra.mxu0 %v111_v10  ;;  %298 = vmatpush1.msra.mxu1 %v243_v21  ;;  %v239_v29 = vld [vmem:[#allocation5 + $0xb0] sm:$0xff]  ;;  %v101_v30 = vld [vmem:[#allocation2 + $0x30] sm:$0xff]  ;;  %v238_v31 = vld [vmem:[#allocation5 + $0xa8] sm:$0xff] }
  0x3c   :  { %160 = vmatprep.subr.mxu0 %v110_v11  ;;  %299 = vmatprep.subr.mxu1 %v242_v23  ;;  %v100_v32 = vld [vmem:[#allocation2 + $0x28] sm:$0xff]  ;;  %v237_v33 = vld [vmem:[#allocation5 + $0xa0] sm:$0xff]  ;;  %v99_v34 = vld [vmem:[#allocation2 + $0x20] sm:$0xff] }
  0x3d   :  { %161 = vmatpush1.msra.mxu0 %v109_v12  ;;  %300 = vmatpush1.msra.mxu1 %v241_v25  ;;  %v236_v35 = vld [vmem:[#allocation5 + $0x98] sm:$0xff]  ;;  %v98_v36 = vld [vmem:[#allocation2 + $0x18] sm:$0xff]  ;;  %v235_v37 = vld [vmem:[#allocation5 + $0x90] sm:$0xff] }
  0x3e   :  { %162 = vmatprep.subr.mxu0 %v108_v16  ;;  %301 = vmatprep.subr.mxu1 %v240_v27  ;;  %v97_v38 = vld [vmem:[#allocation2 + $0x10] sm:$0xff]  ;;  %v234_v39 = vld [vmem:[#allocation5 + $0x88] sm:$0xff]  ;;  %v96_v40 = vld [vmem:[#allocation2 + $0x8] sm:$0xff] }
  0x3f   :  { %163 = vmatpush1.msra.mxu0 %v107_v18  ;;  %302 = vmatpush1.msra.mxu1 %v239_v29  ;;  %v233_v41 = vld [vmem:[#allocation5 + $0x80] sm:$0xff]  ;;  %v95_v42 = vld [vmem:[#allocation2] sm:$0xff]  ;;  %v232_v43 = vld [vmem:[#allocation5 + $0x78] sm:$0xff] }
  0x40   :  { %164 = vmatprep.subr.mxu0 %v106_v20  ;;  %303 = vmatprep.subr.mxu1 %v238_v31  ;;  %v94_v44 = vld [vmem:[%s1167_s0] sm:$0xff]  ;;  %v230_v46 = vld [vmem:[#allocation5 + $0x68] sm:$0xff]  ;;  %v229_v47 = vld [vmem:[#allocation5 + $0x60] sm:$0xff] }
  0x41   :  { %165 = vmatpush1.msra.mxu0 %v105_v22  ;;  %304 = vmatpush1.msra.mxu1 %v237_v33  ;;  %v231_v45 = vld [vmem:[#allocation5 + $0x70] sm:$0xff]  ;;  %v228_v48 = vld [vmem:[#allocation5 + $0x58] sm:$0xff]  ;;  %v226_v50 = vld [vmem:[#allocation5 + $0x48] sm:$0xff] }
  0x42   :  { %166 = vmatprep.subr.mxu0 %v104_v24  ;;  %305 = vmatprep.subr.mxu1 %v236_v35  ;;  %v227_v49 = vld [vmem:[#allocation5 + $0x50] sm:$0xff]  ;;  %v225_v51 = vld [vmem:[#allocation5 + $0x40] sm:$0xff]  ;;  %v224_v52 = vld [vmem:[#allocation5 + $0x38] sm:$0xff] }
  0x43   :  { %167 = vmatpush1.msra.mxu0 %v103_v26  ;;  %306 = vmatpush1.msra.mxu1 %v235_v37  ;;  %v223_v53 = vld [vmem:[#allocation5 + $0x30] sm:$0xff]  ;;  %v222_v54 = vld [vmem:[#allocation5 + $0x28] sm:$0xff]  ;;  %v221_v55 = vld [vmem:[#allocation5 + $0x20] sm:$0xff] }
  0x44   :  { %168 = vmatprep.subr.mxu0 %v102_v28  ;;  %307 = vmatprep.subr.mxu1 %v234_v39  ;;  %v220_v56 = vld [vmem:[#allocation5 + $0x18] sm:$0xff]  ;;  %v219_v57 = vld [vmem:[#allocation5 + $0x10] sm:$0xff]  ;;  %v218_v58 = vld [vmem:[#allocation5 + $0x8] sm:$0xff] }
  0x45   :  { %169 = vmatpush1.msra.mxu0 %v101_v30  ;;  %308 = vmatpush1.msra.mxu1 %v233_v41  ;;  %v217_v59 = vld [vmem:[#allocation5] sm:$0xff]  ;;  %v280_v60 = vld [vmem:[#allocation5 + $0x1f8] sm:$0xff]  ;;  %v279_v61 = vld [vmem:[#allocation5 + $0x1f0] sm:$0xff] }
  0x46   :  { %170 = vmatprep.subr.mxu0 %v100_v32  ;;  %309 = vmatprep.subr.mxu1 %v232_v43  ;;  %v278_v62 = vld [vmem:[#allocation5 + $0x1e8] sm:$0xff]  ;;  %v277_v63 = vld [vmem:[#allocation5 + $0x1e0] sm:$0xff]  ;;  %v276_v0 = vld [vmem:[#allocation5 + $0x1d8] sm:$0xff] }
  0x47   :  { %171 = vmatpush1.msra.mxu0 %v99_v34  ;;  %310 = vmatpush1.msra.mxu1 %v231_v45  ;;  %v275_v1 = vld [vmem:[#allocation5 + $0x1d0] sm:$0xff]  ;;  %v274_v2 = vld [vmem:[#allocation5 + $0x1c8] sm:$0xff]  ;;  %v273_v3 = vld [vmem:[#allocation5 + $0x1c0] sm:$0xff] }
  0x48   :  { %172 = vmatprep.subr.mxu0 %v98_v36  ;;  %311 = vmatprep.subr.mxu1 %v230_v46  ;;  %v272_v4 = vld [vmem:[#allocation5 + $0x1b8] sm:$0xff]  ;;  %v271_v5 = vld [vmem:[#allocation5 + $0x1b0] sm:$0xff]  ;;  %v270_v6 = vld [vmem:[#allocation5 + $0x1a8] sm:$0xff] }
  0x49   :  { %173 = vmatpush1.msra.mxu0 %v97_v38  ;;  %312 = vmatpush1.msra.mxu1 %v229_v47  ;;  %v269_v7 = vld [vmem:[#allocation5 + $0x1a0] sm:$0xff]  ;;  %v268_v8 = vld [vmem:[#allocation5 + $0x198] sm:$0xff]  ;;  %v267_v9 = vld [vmem:[#allocation5 + $0x190] sm:$0xff] }
  0x4a   :  { %174 = vmatprep.subr.mxu0 %v96_v40  ;;  %313 = vmatprep.subr.mxu1 %v228_v48  ;;  %v266_v10 = vld [vmem:[#allocation5 + $0x188] sm:$0xff]  ;;  %v265_v11 = vld [vmem:[#allocation5 + $0x180] sm:$0xff]  ;;  %v264_v12 = vld [vmem:[#allocation5 + $0x178] sm:$0xff] }
  0x4b   :  { %175 = vmatpush1.msra.mxu0 %v95_v42  ;;  %314 = vmatpush1.msra.mxu1 %v227_v49  ;;  %v263_v13 = vld [vmem:[#allocation5 + $0x170] sm:$0xff]  ;;  %v262_v14 = vld [vmem:[#allocation5 + $0x168] sm:$0xff]  ;;  %v261_v15 = vld [vmem:[#allocation5 + $0x160] sm:$0xff] }
  0x4c   :  { %793 = vmatmul.mubr.msk.f32.vlgmr.msra.gmra.mxu0 %vm133_vm1, %v94_v44  ;;  %315 = vmatprep.subr.mxu1 %v226_v50  ;;  %v260_v16 = vld [vmem:[#allocation5 + $0x158] sm:$0xff]  ;;  %v259_v17 = vld [vmem:[#allocation5 + $0x150] sm:$0xff]  ;;  %v258_v18 = vld [vmem:[#allocation5 + $0x148] sm:$0xff] }
  0x4d   :  { %316 = vmatpush1.msra.mxu1 %v225_v51  ;;  %v257_v19 = vld [vmem:[#allocation5 + $0x140] sm:$0xff]  ;;  %v256_v20 = vld [vmem:[#allocation5 + $0x138] sm:$0xff]  ;;  %v255_v21 = vld [vmem:[#allocation5 + $0x130] sm:$0xff] }
  0x4e   :  { %317 = vmatprep.subr.mxu1 %v224_v52  ;;  %v254_v22 = vld [vmem:[#allocation5 + $0x128] sm:$0xff]  ;;  %v253_v23 = vld [vmem:[#allocation5 + $0x120] sm:$0xff]  ;;  %v252_v24 = vld [vmem:[#allocation5 + $0x118] sm:$0xff] }
  0x4f   :  { %318 = vmatpush1.msra.mxu1 %v223_v53  ;;  %v251_v25 = vld [vmem:[#allocation5 + $0x110] sm:$0xff]  ;;  %v250_v26 = vld [vmem:[#allocation5 + $0x108] sm:$0xff]  ;;  %v249_v27 = vld [vmem:[#allocation5 + $0x100] sm:$0xff] }
  0x50   :  { %319 = vmatprep.subr.mxu1 %v222_v54  ;;  %v397_v28 = vld [vmem:[#allocation7 + $0xf8] sm:$0xff]  ;;  %v396_v29 = vld [vmem:[#allocation7 + $0xf0] sm:$0xff]  ;;  %v395_v30 = vld [vmem:[#allocation7 + $0xe8] sm:$0xff] }
  0x51   :  { %320 = vmatpush1.msra.mxu1 %v221_v55  ;;  %442 = vmatprep.subr.mxu0 %v397_v28  ;;  %v394_v31 = vld [vmem:[#allocation7 + $0xe0] sm:$0xff]  ;;  %v393_v32 = vld [vmem:[#allocation7 + $0xd8] sm:$0xff]  ;;  %v392_v33 = vld [vmem:[#allocation7 + $0xd0] sm:$0xff] }
  0x52   :  { %321 = vmatprep.subr.mxu1 %v220_v56  ;;  %443 = vmatpush1.msra.mxu0 %v396_v29  ;;  %v391_v34 = vld [vmem:[#allocation7 + $0xc8] sm:$0xff]  ;;  %v390_v35 = vld [vmem:[#allocation7 + $0xc0] sm:$0xff]  ;;  %v389_v36 = vld [vmem:[#allocation7 + $0xb8] sm:$0xff] }
  0x53   :  { %322 = vmatpush1.msra.mxu1 %v219_v57  ;;  %444 = vmatprep.subr.mxu0 %v395_v30  ;;  %v388_v37 = vld [vmem:[#allocation7 + $0xb0] sm:$0xff]  ;;  %v387_v38 = vld [vmem:[#allocation7 + $0xa8] sm:$0xff]  ;;  %v386_v39 = vld [vmem:[#allocation7 + $0xa0] sm:$0xff] }
  0x54   :  { %323 = vmatprep.subr.mxu1 %v218_v58  ;;  %445 = vmatpush1.msra.mxu0 %v394_v31  ;;  %v385_v40 = vld [vmem:[#allocation7 + $0x98] sm:$0xff]  ;;  %v384_v41 = vld [vmem:[#allocation7 + $0x90] sm:$0xff]  ;;  %v383_v42 = vld [vmem:[#allocation7 + $0x88] sm:$0xff] }
  0x55   :  { %324 = vmatpush1.msra.mxu1 %v217_v59  ;;  %446 = vmatprep.subr.mxu0 %v393_v32  ;;  %v382_v43 = vld [vmem:[#allocation7 + $0x80] sm:$0xff]  ;;  %v381_v44 = vld [vmem:[#allocation7 + $0x78] sm:$0xff]  ;;  %v380_v45 = vld [vmem:[#allocation7 + $0x70] sm:$0xff] }
  0x56   :  { %325 = vmatprep.subr.mxu1 %v280_v60  ;;  %447 = vmatpush1.msra.mxu0 %v392_v33  ;;  %v379_v46 = vld [vmem:[#allocation7 + $0x68] sm:$0xff]  ;;  %v378_v47 = vld [vmem:[#allocation7 + $0x60] sm:$0xff]  ;;  %v377_v48 = vld [vmem:[#allocation7 + $0x58] sm:$0xff] }
  0x57   :  { %326 = vmatpush2.msra.mxu1 %v279_v61  ;;  %448 = vmatprep.subr.mxu0 %v391_v34  ;;  %v376_v49 = vld [vmem:[#allocation7 + $0x50] sm:$0xff]  ;;  %v375_v50 = vld [vmem:[#allocation7 + $0x48] sm:$0xff]  ;;  %v374_v51 = vld [vmem:[#allocation7 + $0x40] sm:$0xff] }
  0x58   :  { %327 = vmatprep.subr.mxu1 %v278_v62  ;;  %449 = vmatpush1.msra.mxu0 %v390_v35  ;;  %v373_v52 = vld [vmem:[#allocation7 + $0x38] sm:$0xff]  ;;  %v372_v53 = vld [vmem:[#allocation7 + $0x30] sm:$0xff]  ;;  %v371_v54 = vld [vmem:[#allocation7 + $0x28] sm:$0xff] }
  0x59   :  { %328 = vmatpush2.msra.mxu1 %v277_v63  ;;  %450 = vmatprep.subr.mxu0 %v389_v36  ;;  %v370_v55 = vld [vmem:[#allocation7 + $0x20] sm:$0xff]  ;;  %v369_v56 = vld [vmem:[#allocation7 + $0x18] sm:$0xff]  ;;  %v368_v57 = vld [vmem:[#allocation7 + $0x10] sm:$0xff] }
  0x5a   :  { %329 = vmatprep.subr.mxu1 %v276_v0  ;;  %451 = vmatpush1.msra.mxu0 %v388_v37  ;;  %v367_v58 = vld [vmem:[#allocation7 + $0x8] sm:$0xff]  ;;  %v366_v59 = vld [vmem:[#allocation7] sm:$0xff]  ;;  %v429_v60 = vld [vmem:[#allocation7 + $0x1f8] sm:$0xff] }
  0x5b   :  { %330 = vmatpush2.msra.mxu1 %v275_v1  ;;  %452 = vmatprep.subr.mxu0 %v387_v38  ;;  %v428_v61 = vld [vmem:[#allocation7 + $0x1f0] sm:$0xff]  ;;  %v427_v62 = vld [vmem:[#allocation7 + $0x1e8] sm:$0xff]  ;;  %v426_v63 = vld [vmem:[#allocation7 + $0x1e0] sm:$0xff] }
  0x5c   :  { %331 = vmatprep.subr.mxu1 %v274_v2  ;;  %453 = vmatpush1.msra.mxu0 %v386_v39  ;;  %v425_v0 = vld [vmem:[#allocation7 + $0x1d8] sm:$0xff]  ;;  %v424_v1 = vld [vmem:[#allocation7 + $0x1d0] sm:$0xff]  ;;  %v423_v2 = vld [vmem:[#allocation7 + $0x1c8] sm:$0xff] }
  0x5d   :  { %332 = vmatpush2.msra.mxu1 %v273_v3  ;;  %454 = vmatprep.subr.mxu0 %v385_v40  ;;  %v422_v3 = vld [vmem:[#allocation7 + $0x1c0] sm:$0xff]  ;;  %v405_v33 = vld [vmem:[#allocation7 + $0x138] sm:$0xff]  ;;  %v404_v34 = vld [vmem:[#allocation7 + $0x130] sm:$0xff] }
  0x5e   :  { %333 = vmatprep.subr.mxu1 %v272_v4  ;;  %455 = vmatpush1.msra.mxu0 %v384_v41  ;;  %v421_v4 = vld [vmem:[#allocation7 + $0x1b8] sm:$0xff]  ;;  %v403_v35 = vld [vmem:[#allocation7 + $0x128] sm:$0xff]  ;;  %v402_v36 = vld [vmem:[#allocation7 + $0x120] sm:$0xff] }
  0x5f   :  { %334 = vmatpush2.msra.mxu1 %v271_v5  ;;  %456 = vmatprep.subr.mxu0 %v383_v42  ;;  %v420_v5 = vld [vmem:[#allocation7 + $0x1b0] sm:$0xff]  ;;  %v401_v37 = vld [vmem:[#allocation7 + $0x118] sm:$0xff]  ;;  %v399_v39 = vld [vmem:[#allocation7 + $0x108] sm:$0xff] }
  0x60   :  { %335 = vmatprep.subr.mxu1 %v270_v6  ;;  %457 = vmatpush1.msra.mxu0 %v382_v43  ;;  %v419_v6 = vld [vmem:[#allocation7 + $0x1a8] sm:$0xff]  ;;  %v400_v38 = vld [vmem:[#allocation7 + $0x110] sm:$0xff]  ;;  %v398_v40 = vld [vmem:[#allocation7 + $0x100] sm:$0xff] }
  0x61   :  { %336 = vmatpush2.msra.mxu1 %v269_v7  ;;  %458 = vmatprep.subr.mxu0 %v381_v44  ;;  %v418_v7 = vld [vmem:[#allocation7 + $0x1a0] sm:$0xff]  ;;  %v546_v41 = vld [vmem:[#allocation8 + $0xf8] sm:$0xff]  ;;  %v545_v42 = vld [vmem:[#allocation8 + $0xf0] sm:$0xff] }
  0x62   :  { %337 = vmatprep.subr.mxu1 %v268_v8  ;;  %459 = vmatpush1.msra.mxu0 %v380_v45  ;;  %v417_v8 = vld [vmem:[#allocation7 + $0x198] sm:$0xff]  ;;  %v544_v43 = vld [vmem:[#allocation8 + $0xe8] sm:$0xff]  ;;  %v543_v44 = vld [vmem:[#allocation8 + $0xe0] sm:$0xff] }
  0x63   :  { %338 = vmatpush2.msra.mxu1 %v267_v9  ;;  %460 = vmatprep.subr.mxu0 %v379_v46  ;;  %v416_v9 = vld [vmem:[#allocation7 + $0x190] sm:$0xff]  ;;  %v542_v45 = vld [vmem:[#allocation8 + $0xd8] sm:$0xff] }
  0x64   :  { %339 = vmatprep.subr.mxu1 %v266_v10  ;;  %461 = vmatpush1.msra.mxu0 %v378_v47  ;;  %v415_v10 = vld [vmem:[#allocation7 + $0x188] sm:$0xff]  ;;  %v541_v46 = vld [vmem:[#allocation8 + $0xd0] sm:$0xff] }
  0x65   :  { %340 = vmatpush2.msra.mxu1 %v265_v11  ;;  %462 = vmatprep.subr.mxu0 %v377_v48  ;;  %v414_v11 = vld [vmem:[#allocation7 + $0x180] sm:$0xff]  ;;  %v540_v47 = vld [vmem:[#allocation8 + $0xc8] sm:$0xff] }
  0x66   :  { %341 = vmatprep.subr.mxu1 %v264_v12  ;;  %463 = vmatpush1.msra.mxu0 %v376_v49  ;;  %v413_v12 = vld [vmem:[#allocation7 + $0x178] sm:$0xff]  ;;  %v539_v48 = vld [vmem:[#allocation8 + $0xc0] sm:$0xff] }
  0x67   :  { %342 = vmatpush2.msra.mxu1 %v263_v13  ;;  %464 = vmatprep.subr.mxu0 %v375_v50  ;;  %v412_v13 = vld [vmem:[#allocation7 + $0x170] sm:$0xff]  ;;  %v538_v49 = vld [vmem:[#allocation8 + $0xb8] sm:$0xff] }
  0x68   :  { %343 = vmatprep.subr.mxu1 %v262_v14  ;;  %465 = vmatpush1.msra.mxu0 %v374_v51  ;;  %v411_v14 = vld [vmem:[#allocation7 + $0x168] sm:$0xff]  ;;  %v537_v50 = vld [vmem:[#allocation8 + $0xb0] sm:$0xff] }
  0x69   :  { %344 = vmatpush2.msra.mxu1 %v261_v15  ;;  %466 = vmatprep.subr.mxu0 %v373_v52  ;;  %v410_v15 = vld [vmem:[#allocation7 + $0x160] sm:$0xff]  ;;  %v536_v51 = vld [vmem:[#allocation8 + $0xa8] sm:$0xff] }
  0x6a   :  { %345 = vmatprep.subr.mxu1 %v260_v16  ;;  %467 = vmatpush1.msra.mxu0 %v372_v53  ;;  %v409_v16 = vld [vmem:[#allocation7 + $0x158] sm:$0xff]  ;;  %v535_v52 = vld [vmem:[#allocation8 + $0xa0] sm:$0xff] }
  0x6b   :  { %346 = vmatpush2.msra.mxu1 %v259_v17  ;;  %468 = vmatprep.subr.mxu0 %v371_v54  ;;  %v408_v17 = vld [vmem:[#allocation7 + $0x150] sm:$0xff]  ;;  %v534_v53 = vld [vmem:[#allocation8 + $0x98] sm:$0xff] }
  0x6c   :  { %347 = vmatprep.subr.mxu1 %v258_v18  ;;  %469 = vmatpush1.msra.mxu0 %v370_v55  ;;  %v407_v18 = vld [vmem:[#allocation7 + $0x148] sm:$0xff]  ;;  %v533_v54 = vld [vmem:[#allocation8 + $0x90] sm:$0xff] }
  0x6d   :  { %348 = vmatpush2.msra.mxu1 %v257_v19  ;;  %470 = vmatprep.subr.mxu0 %v369_v56  ;;  %v406_v19 = vld [vmem:[#allocation7 + $0x140] sm:$0xff]  ;;  %v532_v55 = vld [vmem:[#allocation8 + $0x88] sm:$0xff] }
  0x6e   :  { %349 = vmatprep.subr.mxu1 %v256_v20  ;;  %471 = vmatpush1.msra.mxu0 %v368_v57  ;;  %v123_v20 = vlaneseq  ;;  %v531_v56 = vld [vmem:[#allocation8 + $0x80] sm:$0xff]  ;;  %v530_v57 = vld [vmem:[#allocation8 + $0x78] sm:$0xff] }
  0x6f   :  { %350 = vmatpush2.msra.mxu1 %v255_v21  ;;  %472 = vmatprep.subr.mxu0 %v367_v58  ;;  %v529_v58 = vld [vmem:[#allocation8 + $0x70] sm:$0xff] }
  0x70   :  { %351 = vmatprep.subr.mxu1 %v254_v22  ;;  %473 = vmatpush1.msra.mxu0 %v366_v59  ;;  %v124_v21 = vshrl.u32 %v123_v20, 7  ;;  %v528_v59 = vld [vmem:[#allocation8 + $0x68] sm:$0xff]  ;;  %v567_v20 = vld [vmem:[#allocation8 + $0x1a0] sm:$0xff] }
  0x71   :  { %352 = vmatpush2.msra.mxu1 %v253_v23  ;;  %474 = vmatprep.subr.mxu0 %v429_v60  ;;  %v121_v23 = vld [vmem:[%s1169_s2] sm:$0x3]  ;;  %v527_v60 = vld [vmem:[#allocation8 + $0x60] sm:$0xff] }
  0x72   :  { %353 = vmatprep.subr.mxu1 %v252_v24  ;;  %475 = vmatpush2.msra.mxu0 %v428_v61  ;;  %v1041_v22 = vsub.s32 0, %v124_v21  ;;  %v1046_v24 = vsub.s32 1, %v124_v21  ;;  %v526_v61 = vld [vmem:[#allocation8 + $0x58] sm:$0xff] }
  0x73   :  { %354 = vmatpush2.msra.mxu1 %v251_v25  ;;  %476 = vmatprep.subr.mxu0 %v427_v62  ;;  %v525_v62 = vld [vmem:[#allocation8 + $0x50] sm:$0xff]  ;;  %v566_v21 = vld [vmem:[#allocation8 + $0x198] sm:$0xff] }
  0x74   :  { %355 = vmatprep.subr.mxu1 %v250_v26  ;;  %477 = vmatpush2.msra.mxu0 %v426_v63  ;;  %v126_v25 = vrot.slane %v121_v23, %v1041_v22  ;;  %v130_v26 = vrot.slane %v121_v23, %v1046_v24  ;;  %v524_v63 = vld [vmem:[#allocation8 + $0x48] sm:$0xff]  ;;  %v565_v23 = vld [vmem:[#allocation8 + $0x190] sm:$0xff] }
  0x75   :  { %356 = vmatpush2.msra.mxu1 %v249_v27  ;;  %478 = vmatprep.subr.mxu0 %v425_v0  ;;  %v523_v0 = vld [vmem:[#allocation8 + $0x40] sm:$0xff] }
  0x76   :  { %479 = vmatpush2.msra.mxu0 %v424_v1  ;;  %591 = vmatprep.subr.mxu1 %v546_v41  ;;  %v522_v1 = vld [vmem:[#allocation8 + $0x38] sm:$0xff] }
  0x77   :  { %480 = vmatprep.subr.mxu0 %v423_v2  ;;  %v521_v2 = vld [vmem:[#allocation8 + $0x30] sm:$0xff] }
  0x78   :  { %481 = vmatpush2.msra.mxu0 %v422_v3  ;;  %v520_v3 = vld [vmem:[#allocation8 + $0x28] sm:$0xff] }
  0x79   :  { %482 = vmatprep.subr.mxu0 %v421_v4  ;;  %v519_v4 = vld [vmem:[#allocation8 + $0x20] sm:$0xff] }
  0x7a   :  { %483 = vmatpush2.msra.mxu0 %v420_v5  ;;  %v518_v5 = vld [vmem:[#allocation8 + $0x18] sm:$0xff] }
  0x7b   :  { %484 = vmatprep.subr.mxu0 %v419_v6  ;;  %v517_v6 = vld [vmem:[#allocation8 + $0x10] sm:$0xff] }
  0x7c   :  { %485 = vmatpush2.msra.mxu0 %v418_v7  ;;  %v516_v7 = vld [vmem:[#allocation8 + $0x8] sm:$0xff] }
  0x7d   :  { %486 = vmatprep.subr.mxu0 %v417_v8  ;;  %v515_v8 = vld [vmem:[#allocation8] sm:$0xff] }
  0x7e   :  { %487 = vmatpush2.msra.mxu0 %v416_v9  ;;  %v578_v9 = vld [vmem:[#allocation8 + $0x1f8] sm:$0xff] }
  0x7f   :  { %488 = vmatprep.subr.mxu0 %v415_v10  ;;  %v577_v10 = vld [vmem:[#allocation8 + $0x1f0] sm:$0xff] }
  0x80   :  { %489 = vmatpush2.msra.mxu0 %v414_v11  ;;  %v576_v11 = vld [vmem:[#allocation8 + $0x1e8] sm:$0xff] }
  0x81   :  { %490 = vmatprep.subr.mxu0 %v413_v12  ;;  %v575_v12 = vld [vmem:[#allocation8 + $0x1e0] sm:$0xff] }
  0x82   :  { %491 = vmatpush2.msra.mxu0 %v412_v13  ;;  %v574_v13 = vld [vmem:[#allocation8 + $0x1d8] sm:$0xff] }
  0x83   :  { %492 = vmatprep.subr.mxu0 %v411_v14  ;;  %v573_v14 = vld [vmem:[#allocation8 + $0x1d0] sm:$0xff] }
  0x84   :  { %493 = vmatpush2.msra.mxu0 %v410_v15  ;;  %v572_v15 = vld [vmem:[#allocation8 + $0x1c8] sm:$0xff] }
  0x85   :  { %494 = vmatprep.subr.mxu0 %v409_v16  ;;  %v571_v16 = vld [vmem:[#allocation8 + $0x1c0] sm:$0xff] }
  0x86   :  { %495 = vmatpush2.msra.mxu0 %v408_v17  ;;  %v570_v17 = vld [vmem:[#allocation8 + $0x1b8] sm:$0xff] }
  0x87   :  { %496 = vmatprep.subr.mxu0 %v407_v18  ;;  %v569_v18 = vld [vmem:[#allocation8 + $0x1b0] sm:$0xff] }
  0x88   :  { %497 = vmatpush2.msra.mxu0 %v406_v19  ;;  %v568_v19 = vld [vmem:[#allocation8 + $0x1a8] sm:$0xff] }
  0x89   :  { %498 = vmatprep.subr.mxu0 %v405_v33  ;;  %v556_v33 = vld [vmem:[#allocation8 + $0x148] sm:$0xff] }
  0x8a   :  { %499 = vmatpush2.msra.mxu0 %v404_v34  ;;  %v555_v34 = vld [vmem:[#allocation8 + $0x140] sm:$0xff] }
  0x8b   :  { %500 = vmatprep.subr.mxu0 %v403_v35  ;;  %v281_v35 = vld [vmem:[%s1171_s4] sm:$0x3] }
  0x8c   :  { %501 = vmatpush2.msra.mxu0 %v402_v36  ;;  %v286_v36 = vrot.slane %v281_v35, %v1041_v22 }
  0x8d   :  { %502 = vmatprep.subr.mxu0 %v401_v37  ;;  %v290_v37 = vrot.slane %v281_v35, %v1046_v24 }
  0x8e   :  { %503 = vmatpush2.msra.mxu0 %v400_v38 }
  0x8f   :  { %504 = vmatprep.subr.mxu0 %v399_v39 }
  0x90   :  { %505 = vmatpush2.msra.mxu0 %v398_v40 }
 0x10c   :  { %v210_v27 = vpop.f32.mrf.mxu0 }
 0x10d   :  { %v211_v28 = vadd.f32 %v210_v27, %v126_v25  ;;  %v564_v25 = vld [vmem:[#allocation8 + $0x188] sm:$0xff]  ;;  %v562_v27 = vld [vmem:[#allocation8 + $0x178] sm:$0xff] }
 0x10e   :  { %v212_v29 = vpop.f32.mrf.mxu0 }
 0x10f   :  { %v213_v30 = vadd.f32 %v212_v29, %v130_v26  ;;  %v215_v32 = vmax.f32 %v211_v28, 0.0  ;;  %v563_v26 = vld [vmem:[#allocation8 + $0x180] sm:$0xff]  ;;  %v561_v28 = vld [vmem:[#allocation8 + $0x170] sm:$0xff]  ;;  %v560_v29 = vld [vmem:[#allocation8 + $0x168] sm:$0xff] }
 0x111   :  { %v216_v31 = vmax.f32 %v213_v30, 0.0  ;;  %v559_v30 = vld [vmem:[#allocation8 + $0x160] sm:$0xff] }
 0x113   :  { %357 = vmatprep.mubr.f32.mxu1 %v216_v31  ;;  %v558_v31 = vld [vmem:[#allocation8 + $0x158] sm:$0xff] }
 0x114   :  { %358 = vmatmul.mubr.f32.vlgmr.msra.gmra.mxu1 %v215_v32  ;;  %v557_v32 = vld [vmem:[#allocation8 + $0x150] sm:$0xff] }
 0x115   :  { %592 = vmatpush1.msra.mxu1 %v545_v42 }
 0x116   :  { %593 = vmatprep.subr.mxu1 %v544_v43 }
 0x117   :  { %594 = vmatpush1.msra.mxu1 %v543_v44  ;;  %v554_v44 = vld [vmem:[#allocation8 + $0x138] sm:$0xff] }
 0x118   :  { %595 = vmatprep.subr.mxu1 %v542_v45  ;;  %v553_v45 = vld [vmem:[#allocation8 + $0x130] sm:$0xff] }
 0x119   :  { %596 = vmatpush1.msra.mxu1 %v541_v46  ;;  %v552_v46 = vld [vmem:[#allocation8 + $0x128] sm:$0xff] }
 0x11a   :  { %597 = vmatprep.subr.mxu1 %v540_v47  ;;  %v551_v47 = vld [vmem:[#allocation8 + $0x120] sm:$0xff] }
 0x11b   :  { %598 = vmatpush1.msra.mxu1 %v539_v48  ;;  %v550_v48 = vld [vmem:[#allocation8 + $0x118] sm:$0xff] }
 0x11c   :  { %599 = vmatprep.subr.mxu1 %v538_v49  ;;  %v549_v49 = vld [vmem:[#allocation8 + $0x110] sm:$0xff] }
 0x11d   :  { %600 = vmatpush1.msra.mxu1 %v537_v50  ;;  %v548_v50 = vld [vmem:[#allocation8 + $0x108] sm:$0xff] }
 0x11e   :  { %601 = vmatprep.subr.mxu1 %v536_v51  ;;  %v547_v51 = vld [vmem:[#allocation8 + $0x100] sm:$0xff] }
 0x11f   :  { %602 = vmatpush1.msra.mxu1 %v535_v52  ;;  %v695_v52 = vld [vmem:[%s1176_s9 + $0xf8] sm:$0xff] }
 0x120   :  { %603 = vmatprep.subr.mxu1 %v534_v53  ;;  %v679_v53 = vld [vmem:[%s1176_s9 + $0x78] sm:$0xff]  ;;  %795 = vmatprep.subr.mxu0 %v695_v52 }
 0x121   :  { %604 = vmatpush1.msra.mxu1 %v533_v54  ;;  %v694_v54 = vld [vmem:[%s1176_s9 + $0xf0] sm:$0xff] }
 0x122   :  { %605 = vmatprep.subr.mxu1 %v532_v55  ;;  %v678_v55 = vld [vmem:[%s1176_s9 + $0x70] sm:$0xff] }
 0x123   :  { %606 = vmatpush1.msra.mxu1 %v531_v56  ;;  %v693_v56 = vld [vmem:[%s1176_s9 + $0xe8] sm:$0xff] }
 0x124   :  { %607 = vmatprep.subr.mxu1 %v530_v57  ;;  %v677_v57 = vld [vmem:[%s1176_s9 + $0x68] sm:$0xff] }
 0x125   :  { %608 = vmatpush1.msra.mxu1 %v529_v58  ;;  %v692_v58 = vld [vmem:[%s1176_s9 + $0xe0] sm:$0xff] }
 0x126   :  { %609 = vmatprep.subr.mxu1 %v528_v59  ;;  %v676_v59 = vld [vmem:[%s1176_s9 + $0x60] sm:$0xff] }
 0x127   :  { %610 = vmatpush1.msra.mxu1 %v527_v60  ;;  %v691_v60 = vld [vmem:[%s1176_s9 + $0xd8] sm:$0xff] }
 0x128   :  { %611 = vmatprep.subr.mxu1 %v526_v61  ;;  %v675_v61 = vld [vmem:[%s1176_s9 + $0x58] sm:$0xff] }
 0x129   :  { %612 = vmatpush1.msra.mxu1 %v525_v62  ;;  %v690_v62 = vld [vmem:[%s1176_s9 + $0xd0] sm:$0xff] }
 0x12a   :  { %613 = vmatprep.subr.mxu1 %v524_v63  ;;  %v674_v63 = vld [vmem:[%s1176_s9 + $0x50] sm:$0xff] }
 0x12b   :  { %614 = vmatpush1.msra.mxu1 %v523_v0  ;;  %v689_v0 = vld [vmem:[%s1176_s9 + $0xc8] sm:$0xff] }
 0x12c   :  { %615 = vmatprep.subr.mxu1 %v522_v1  ;;  %v673_v1 = vld [vmem:[%s1176_s9 + $0x48] sm:$0xff] }
 0x12d   :  { %616 = vmatpush1.msra.mxu1 %v521_v2  ;;  %v688_v2 = vld [vmem:[%s1176_s9 + $0xc0] sm:$0xff] }
 0x12e   :  { %617 = vmatprep.subr.mxu1 %v520_v3  ;;  %v672_v3 = vld [vmem:[%s1176_s9 + $0x40] sm:$0xff] }
 0x12f   :  { %618 = vmatpush1.msra.mxu1 %v519_v4  ;;  %v687_v4 = vld [vmem:[%s1176_s9 + $0xb8] sm:$0xff] }
 0x130   :  { %619 = vmatprep.subr.mxu1 %v518_v5  ;;  %v671_v5 = vld [vmem:[%s1176_s9 + $0x38] sm:$0xff] }
 0x131   :  { %620 = vmatpush1.msra.mxu1 %v517_v6  ;;  %v686_v6 = vld [vmem:[%s1176_s9 + $0xb0] sm:$0xff] }
 0x132   :  { %621 = vmatprep.subr.mxu1 %v516_v7  ;;  %v670_v7 = vld [vmem:[%s1176_s9 + $0x30] sm:$0xff] }
 0x133   :  { %622 = vmatpush1.msra.mxu1 %v515_v8  ;;  %v685_v8 = vld [vmem:[%s1176_s9 + $0xa8] sm:$0xff] }
 0x134   :  { %623 = vmatprep.subr.mxu1 %v578_v9  ;;  %v669_v9 = vld [vmem:[%s1176_s9 + $0x28] sm:$0xff] }
 0x135   :  { %624 = vmatpush2.msra.mxu1 %v577_v10  ;;  %v684_v10 = vld [vmem:[%s1176_s9 + $0xa0] sm:$0xff] }
 0x136   :  { %625 = vmatprep.subr.mxu1 %v576_v11  ;;  %v668_v11 = vld [vmem:[%s1176_s9 + $0x20] sm:$0xff] }
 0x137   :  { %626 = vmatpush2.msra.mxu1 %v575_v12  ;;  %v430_v12 = vld [vmem:[%s1173_s6] sm:$0x3] }
 0x138   :  { %627 = vmatprep.subr.mxu1 %v574_v13  ;;  %v435_v13 = vrot.slane %v430_v12, %v1041_v22 }
 0x139   :  { %628 = vmatpush2.msra.mxu1 %v573_v14  ;;  %v439_v14 = vrot.slane %v430_v12, %v1046_v24 }
 0x13a   :  { %629 = vmatprep.subr.mxu1 %v572_v15 }
 0x13b   :  { %630 = vmatpush2.msra.mxu1 %v571_v16 }
 0x13c   :  { %631 = vmatprep.subr.mxu1 %v570_v17 }
 0x13d   :  { %632 = vmatpush2.msra.mxu1 %v569_v18 }
 0x13e   :  { %633 = vmatprep.subr.mxu1 %v568_v19 }
 0x13f   :  { %634 = vmatpush2.msra.mxu1 %v567_v20 }
 0x140   :  { %635 = vmatprep.subr.mxu1 %v566_v21  ;;  %v683_v21 = vld [vmem:[%s1176_s9 + $0x98] sm:$0xff] }
 0x141   :  { %636 = vmatpush2.msra.mxu1 %v565_v23  ;;  %v667_v23 = vld [vmem:[%s1176_s9 + $0x18] sm:$0xff] }
 0x142   :  { %637 = vmatprep.subr.mxu1 %v564_v25  ;;  %v682_v25 = vld [vmem:[%s1176_s9 + $0x90] sm:$0xff] }
 0x143   :  { %638 = vmatpush2.msra.mxu1 %v563_v26  ;;  %v666_v26 = vld [vmem:[%s1176_s9 + $0x10] sm:$0xff] }
 0x144   :  { %639 = vmatprep.subr.mxu1 %v562_v27  ;;  %v681_v27 = vld [vmem:[%s1176_s9 + $0x88] sm:$0xff] }
 0x145   :  { %640 = vmatpush2.msra.mxu1 %v561_v28  ;;  %v665_v28 = vld [vmem:[%s1176_s9 + $0x8] sm:$0xff] }
 0x146   :  { %641 = vmatprep.subr.mxu1 %v560_v29  ;;  %v680_v29 = vld [vmem:[%s1176_s9 + $0x80] sm:$0xff] }
 0x147   :  { %642 = vmatpush2.msra.mxu1 %v559_v30  ;;  %v664_v30 = vld [vmem:[%s1176_s9] sm:$0xff] }
 0x148   :  { %643 = vmatprep.subr.mxu1 %v558_v31  ;;  %v579_v31 = vld [vmem:[%s1175_s8] sm:$0x3]  ;;  %s780_s8 = sshll.u32 %s953_s15, 4  ;;  %s781_s8 = int_to_ptr.vmem [resolvable:$true] %s780_s8 }
 0x149   :  { %644 = vmatpush2.msra.mxu1 %v557_v32  ;;  %v584_v32 = vrot.slane %v579_v31, %v1041_v22  ;;  %s918_s1 = scalar_lea.vmem %s781_s8, 128  ;;  %p923_p7 = scmp.lt.s32.totalorder %s781_s8, %s781_s8 }
 0x14a   :  { %645 = vmatprep.subr.mxu1 %v556_v33  ;;  %v588_v33 = vrot.slane %v579_v31, %v1046_v24  ;;  %p919_p6 = scmp.ne.s32.totalorder %s781_s8, %s918_s1  ;;  %p924_p8 = scmp.lt.s32.totalorder %s918_s1, %s918_s1 }
 0x14b   :  { %646 = vmatpush2.msra.mxu1 %v555_v34 }
 0x14c   :  { %647 = vmatprep.subr.mxu1 %v554_v44  ;;  %p925_p9 = por %p924_p8, %p923_p7 }
 0x14d   :  { %648 = vmatpush2.msra.mxu1 %v553_v45 }
 0x14e   :  { %649 = vmatprep.subr.mxu1 %v552_v46  ;;  %p926_p10 = pnand %p925_p9, %p919_p6 }
 0x14f   :  { %650 = vmatpush2.msra.mxu1 %v551_v47 }
 0x150   :  { %651 = vmatprep.subr.mxu1 %v550_v48 }
 0x151   :  { %652 = vmatpush2.msra.mxu1 %v549_v49 }
 0x152   :  { %653 = vmatprep.subr.mxu1 %v548_v50 }
 0x153   :  { %654 = vmatpush2.msra.mxu1 %v547_v51 }
 0x1d4   :  { %v359_v38 = vpop.f32.mrf.mxu1 }
 0x1d5   :  { %v360_v39 = vadd.f32 %v359_v38, %v286_v36 }
 0x1d6   :  { %v361_v40 = vpop.f32.mrf.mxu1 }
 0x1d7   :  { %v362_v41 = vadd.f32 %v361_v40, %v290_v37  ;;  %v364_v43 = vmax.f32 %v360_v39, 0.0 }
 0x1d9   :  { %v365_v42 = vmax.f32 %v362_v41, 0.0  ;;  %v794_v41 = vld [vmem:[%s1177_s10] ss:$0 sm:$0xff] }
 0x1db   :  { %506 = vmatprep.mubr.f32.mxu0 %v365_v42 }
 0x1dc   :  { %507 = vmatmul.mubr.f32.vlgmr.msra.gmra.mxu0 %v364_v43 }
 0x1dd   :  { %796 = vmatpush3.msra.mxu0 %v679_v53 }
 0x1de   :  { %797 = vmatprep.subr.mxu0 %v694_v54 }
 0x1df   :  { %798 = vmatpush3.msra.mxu0 %v678_v55 }
 0x1e0   :  { %799 = vmatprep.subr.mxu0 %v693_v56 }
 0x1e1   :  { %800 = vmatpush3.msra.mxu0 %v677_v57 }
 0x1e2   :  { %801 = vmatprep.subr.mxu0 %v692_v58 }
 0x1e3   :  { %802 = vmatpush3.msra.mxu0 %v676_v59 }
 0x1e4   :  { %803 = vmatprep.subr.mxu0 %v691_v60 }
 0x1e5   :  { %804 = vmatpush3.msra.mxu0 %v675_v61 }
 0x1e6   :  { %805 = vmatprep.subr.mxu0 %v690_v62 }
 0x1e7   :  { %806 = vmatpush3.msra.mxu0 %v674_v63 }
 0x1e8   :  { %807 = vmatprep.subr.mxu0 %v689_v0 }
 0x1e9   :  { %808 = vmatpush3.msra.mxu0 %v673_v1 }
 0x1ea   :  { %809 = vmatprep.subr.mxu0 %v688_v2 }
 0x1eb   :  { %810 = vmatpush3.msra.mxu0 %v672_v3 }
 0x1ec   :  { %811 = vmatprep.subr.mxu0 %v687_v4 }
 0x1ed   :  { %812 = vmatpush3.msra.mxu0 %v671_v5 }
 0x1ee   :  { %813 = vmatprep.subr.mxu0 %v686_v6 }
 0x1ef   :  { %814 = vmatpush3.msra.mxu0 %v670_v7 }
 0x1f0   :  { %815 = vmatprep.subr.mxu0 %v685_v8 }
 0x1f1   :  { %816 = vmatpush3.msra.mxu0 %v669_v9 }
 0x1f2   :  { %817 = vmatprep.subr.mxu0 %v684_v10 }
 0x1f3   :  { %818 = vmatpush3.msra.mxu0 %v668_v11 }
 0x1f4   :  { %819 = vmatprep.subr.mxu0 %v683_v21 }
 0x1f5   :  { %820 = vmatpush3.msra.mxu0 %v667_v23 }
 0x1f6   :  { %821 = vmatprep.subr.mxu0 %v682_v25 }
 0x1f7   :  { %822 = vmatpush3.msra.mxu0 %v666_v26 }
 0x1f8   :  { %823 = vmatprep.subr.mxu0 %v681_v27 }
 0x1f9   :  { %824 = vmatpush3.msra.mxu0 %v665_v28 }
 0x1fa   :  { %825 = vmatprep.subr.mxu0 %v680_v29 }
 0x1fb   :  { %826 = vmatpush3.msra.mxu0 %v664_v30 }
 0x29c   :  { %v508_v15 = vpop.f32.mrf.mxu0 }
 0x29d   :  { %v509_v16 = vadd.f32 %v508_v15, %v435_v13 }
 0x29e   :  { %v510_v17 = vpop.f32.mrf.mxu0 }
 0x29f   :  { %v511_v18 = vadd.f32 %v510_v17, %v439_v14  ;;  %v513_v20 = vmax.f32 %v509_v16, 0.0 }
 0x2a1   :  { %v514_v19 = vmax.f32 %v511_v18, 0.0 }
 0x2a3   :  { %655 = vmatprep.mubr.f32.mxu1 %v514_v19 }
 0x2a4   :  { %656 = vmatmul.mubr.f32.vlgmr.msra.gmra.mxu1 %v513_v20 }
 0x364   :  { %v657_v34 = vpop.f32.mrf.mxu1 }
 0x365   :  { %v658_v35 = vadd.f32 %v657_v34, %v584_v32 }
 0x366   :  { %v659_v36 = vpop.f32.mrf.mxu1 }
 0x367   :  { %v660_v37 = vadd.f32 %v659_v36, %v588_v33  ;;  %v662_v39 = vmax.f32 %v658_v35, 0.0 }
 0x369   :  { %v663_v38 = vmax.f32 %v660_v37, 0.0 }
 0x36b   :  { %767 = vmatprep.mubr.f32.mxu0 %v663_v38 }
 0x36c   :  { %768 = vmatmul.mubr.f32.vlgmr.msra.gmra.mxu0 %v662_v39 }
 0x42c   :  { %v827_v40 = vpop.f32.mrf.mxu0 }
 0x42e   :  { %v828_v42 = vpop.f32.mrf.mxu0 }
 0x42f   :  { %v829_v43 = vadd.f32 %v828_v42, %v827_v40 }
 0x431   :  { %v770_v22 = vadd.f32 %v829_v43, %v794_v41 }
 0x433   :  { %773 = vst [vmem:[#allocation10] sm:$0xff] %v770_v22 }
 0x434   :  { %929 = shalt.err (!%p926_p10)
}
 0x435   :  { %783 = dma.vmem_to_hbm [thread:$0]  %s781_s8, 128, %s1178_s11, [#allocation4]  }
 0x436   :  { %944 = dma.done.wait [#allocation4], 128  }
 0x437   :  { %945 = vsyncadd [#allocation4], 4294967168 }
 0x438   :  { %787 = vsyncpa [#allocation3], 1 }
 0x439   :  { %788 = vsyncpa [#allocation6], 1 }
 0x43a   :  { %789 = vsyncpa [#allocation9], 1 }
 0x43b   :  { %790 = vsyncpa [#allocation4], 1 }

</bundles_post_ra>
